<compile_context>
chip_gen: v7x
topology: tpu7x:2x2x1
jax: 0.10.0
libtpu: 0.0.40
codegen_flags: <defaults>
</compile_context>

<pallas_src>
import jax
import jax.numpy as jnp
from jax.experimental import pallas as pl
from jax.experimental.pallas import tpu as pltpu


def _round_up(x: int, m: int) -> int:
    return ((x + m - 1) // m) * m


_MIB = 1024 * 1024


def _vmem_limit_bytes() -> int:
    """Generation-aware VMEM limit: physical capacity minus headroom for Mosaic
    internal scratch / semaphores. Falls back to a v7x-safe 64 MiB capacity."""
    try:
        cap = pltpu.get_tpu_info().vmem_capacity_bytes
    except Exception:
        cap = 64 * _MIB
    return max(cap - 8 * _MIB, 16 * _MIB)


def prepare_residual_params(weight, bias, *, use_bf16_matmul=False):
    """Once-per-model parameter prep (hoisted out of the forward path).

    use_bf16_matmul=True quantizes the trained f32 weight to bf16 for the MXU —
    an inference-only numerics change vs. the PyTorch module; off by default.
    """
    w = weight.astype(jnp.bfloat16) if use_bf16_matmul else weight.astype(jnp.float32)
    b = bias.astype(jnp.float32).reshape(1, -1)
    return w, b


def _residual_kernel(x_ref, w_ref, b_ref, o_ref):
    """o = relu(x @ W + b) + x   for one (tm, D) row tile."""
    x = x_ref[...]                                             # (tm, D), input dtype
    # MXU matmul in the weight's dtype, f32 accumulation.
    h = jnp.dot(x.astype(w_ref.dtype), w_ref[...],
                preferred_element_type=jnp.float32)            # (tm, D) f32
    h = jnp.maximum(h + b_ref[...], 0.0)                       # bias + ReLU (base branch)
    # Identity-shortcut residual. The bias/ReLU/add VPU ops ride for free under the
    # DMA stalls of this mem-bound kernel — no in-kernel ALU micro-tuning needed.
    o_ref[...] = (h + x.astype(jnp.float32)).astype(o_ref.dtype)


def residual_block_forward(features, lens, weight, bias, *, tm=1024, out_dtype=None):
    """ResidualBlock.forward (identity shortcut, idim == odim).

    features: [B, T, D]  (pass bf16 here to stream activations at half the HBM bytes)
    lens:     [B] int32 (passed through unchanged)
    weight:   [D, D]   (use prepare_residual_params to cast once, outside this call)
    bias:     [D] or [1, D]
    returns (output [B, T, D] in out_dtype or features.dtype, lens)
    """
    B, T, D = features.shape
    M = B * T
    out_dtype = features.dtype if out_dtype is None else out_dtype
    if bias.ndim == 1:
        bias = bias.reshape(1, D)

    x_by = jnp.dtype(features.dtype).itemsize
    o_by = jnp.dtype(out_dtype).itemsize
    w_by = jnp.dtype(weight.dtype).itemsize

    vmem_limit = _vmem_limit_bytes()
    tile_budget = vmem_limit - 8 * _MIB   # keep the tile estimate under the limit

    # Row tile: as large as the data / VMEM budget allows (amortizes per-step overhead).
    tm_eff = min(_round_up(tm, 8), _round_up(M, 8))

    def _vmem_estimate(t):
        return (2 * t * D * x_by          # x tile, double-buffered
                + 2 * t * D * o_by        # out tile, double-buffered
                + 2 * t * D * 4           # f32 intermediates inside the body
                + 1 * D * D * w_by        # resident weight, single-buffered
                + 2 * D * 4)              # bias

    while _vmem_estimate(tm_eff) > tile_budget and tm_eff > 8:
        tm_eff = max(8, _round_up(tm_eff // 2, 8))

    # Ragged last tile handled by Pallas (don't-care reads, masked writes); no padding,
    # no even-grid dead tile.
    grid = (pl.cdiv(M, tm_eff),)

    x2d = features.reshape(M, D)          # contiguous reshape: no HBM traffic

    out2d = pl.pallas_call(
        _residual_kernel,
        out_shape=jax.ShapeDtypeStruct((M, D), out_dtype),
        grid_spec=pltpu.PrefetchScalarGridSpec(
            num_scalar_prefetch=0,
            grid=grid,
            in_specs=[
                pl.BlockSpec((tm_eff, D), lambda i: (i, 0)),          # x row tile
                pl.BlockSpec((D, D), lambda i: (0, 0),                # weight (resident,
                             pipeline_mode=pl.Buffered(1)),           #  single-buffered)
                pl.BlockSpec((1, D), lambda i: (0, 0),                # bias (resident)
                             pipeline_mode=pl.Buffered(1)),
            ],
            out_specs=pl.BlockSpec((tm_eff, D), lambda i: (i, 0)),
        ),
        compiler_params=pltpu.CompilerParams(
            dimension_semantics=("parallel",),
            vmem_limit_bytes=vmem_limit,
        ),
    )(x2d, weight, bias)

    return out2d.reshape(B, T, D), lens


def residual_block_reference(features, lens, weight, bias):
    """Pure-JAX reference for correctness check."""
    h = jnp.maximum(jnp.einsum("btd,de->bte", features, weight) + bias, 0.0)
    return h + features, lens


if __name__ == "__main__":
    key = jax.random.PRNGKey(0)
    k_x, k_w, k_b = jax.random.split(key, 3)

    B, T, D = 2, 8, 32          # batch=2, seq=8, hidden (idim=odim)=32
    features = jax.random.normal(k_x, (B, T, D), dtype=jnp.float32)
    lens = jnp.array([T, T - 2], dtype=jnp.int32)

    # Deterministic parameter init (synthetic, no checkpoint).
    weight = jax.random.normal(k_w, (D, D), dtype=jnp.float32) * (1.0 / jnp.sqrt(D))
    bias = jax.random.normal(k_b, (D,), dtype=jnp.float32) * 0.01

    ref_out, ref_lens = residual_block_reference(features, lens, weight, bias)
    fwd = jax.jit(residual_block_forward)

    # Default path: f32 weights (matches PyTorch parameter numerics). Tolerance is set
    # for the TPU MXU's default-precision matmul of f32 operands (bf16 passes).
    w32, b32 = prepare_residual_params(weight, bias, use_bf16_matmul=False)
    out, lens_o = fwd(features, lens, w32, b32)
    out = jax.block_until_ready(out)
    assert out.shape == ref_out.shape, "shape mismatch vs reference"
    assert jnp.allclose(out, ref_out, atol=3e-2, rtol=3e-2), "mismatch vs reference (f32)"
    assert jnp.array_equal(lens_o, ref_lens), "lens must pass through unchanged"

    # Explicit inference-only opt-in: bf16 weights on the MXU (documented numerics change).
    wbf, bbf = prepare_residual_params(weight, bias, use_bf16_matmul=True)
    out_bf, _ = fwd(features, lens, wbf, bbf)
    out_bf = jax.block_until_ready(out_bf)
    assert jnp.allclose(out_bf, ref_out, atol=3e-2, rtol=3e-2), "mismatch vs reference (bf16)"

    print("KERNEL_OK")
</pallas_src>

<mosaic_0001>
module attributes {stable_mosaic.version = 11 : i64} {
  func.func @_residual_kernel(%arg0: i32, %arg1: memref<16x32xf32, #tpu.memory_space<vmem>>, %arg2: memref<32x32xf32, #tpu.memory_space<vmem>>, %arg3: memref<1x32xf32, #tpu.memory_space<vmem>>, %arg4: memref<16x32xf32, #tpu.memory_space<vmem>>) attributes {dimension_semantics = [#tpu.dimension_semantics<parallel>], iteration_bounds = array<i64: 1>, scalar_prefetch = 0 : i64, scratch_operands = 0 : i64, tpu.core_type = #tpu.core_type<tc>, window_params = [{transform_indices = @transform_0, window_bounds = array<i64: 16, 32>}, {pipeline_mode = #tpu.pipeline_mode<synchronous>, transform_indices = @transform_1, window_bounds = array<i64: 32, 32>}, {pipeline_mode = #tpu.pipeline_mode<synchronous>, transform_indices = @transform_2, window_bounds = array<i64: 1, 32>}, {transform_indices = @transform_3, window_bounds = array<i64: 16, 32>}]} {
    %c0 = arith.constant 0 : index
    %c0_0 = arith.constant 0 : index
    %0 = vector.load %arg1[%c0, %c0_0] : memref<16x32xf32, #tpu.memory_space<vmem>>, vector<16x32xf32>
    %c0_1 = arith.constant 0 : index
    %c0_2 = arith.constant 0 : index
    %1 = vector.load %arg2[%c0_1, %c0_2] : memref<32x32xf32, #tpu.memory_space<vmem>>, vector<32x32xf32>
    %cst = arith.constant dense<0.000000e+00> : vector<16x32xf32>
    %2 = tpu.matmul %0, %1, %cst {dimension_numbers = #tpu.dot_dimension_numbers<[1], [0], [0], [1], [0, 0, 1, 1], [], []>} : vector<16x32xf32>, vector<32x32xf32>, vector<16x32xf32> -> vector<16x32xf32>
    %c0_3 = arith.constant 0 : index
    %c0_4 = arith.constant 0 : index
    %3 = vector.load %arg3[%c0_3, %c0_4] : memref<1x32xf32, #tpu.memory_space<vmem>>, vector<1x32xf32>
    %4 = vector.broadcast %3 : vector<1x32xf32> to vector<16x32xf32>
    %5 = arith.addf %2, %4 : vector<16x32xf32>
    %cst_5 = arith.constant 0.000000e+00 : f32
    %6 = vector.broadcast %cst_5 : f32 to vector<16x32xf32>
    %7 = arith.maximumf %5, %6 : vector<16x32xf32>
    %8 = arith.addf %7, %0 : vector<16x32xf32>
    %c0_6 = arith.constant 0 : index
    %c0_7 = arith.constant 0 : index
    %9 = vector.load %arg4[%c0_6, %c0_7] : memref<16x32xf32, #tpu.memory_space<vmem>>, vector<16x32xf32>
    tpu.vector_store %arg4[%c0_6, %c0_7], %8 {strides = array<i32>} : memref<16x32xf32, #tpu.memory_space<vmem>>, vector<16x32xf32>,
    return
  }
  func.func @transform_0(%arg0: i32) -> (i32, i32) {
    %c0_i32 = arith.constant 0 : i32
    %c0_i32_0 = arith.constant 0 : i32
    return %arg0, %c0_i32 : i32, i32
  }
  func.func @transform_1(%arg0: i32) -> (i32, i32) {
    %c0_i32 = arith.constant 0 : i32
    %c0_i32_0 = arith.constant 0 : i32
    %c0_i32_1 = arith.constant 0 : i32
    return %c0_i32, %c0_i32_0 : i32, i32
  }
  func.func @transform_2(%arg0: i32) -> (i32, i32) {
    %c0_i32 = arith.constant 0 : i32
    %c0_i32_0 = arith.constant 0 : i32
    %c0_i32_1 = arith.constant 0 : i32
    return %c0_i32, %c0_i32_0 : i32, i32
  }
  func.func @transform_3(%arg0: i32) -> (i32, i32) {
    %c0_i32 = arith.constant 0 : i32
    %c0_i32_0 = arith.constant 0 : i32
    return %arg0, %c0_i32 : i32, i32
  }
}

</mosaic_0001>

<bundles_post_ra>
// kernel: residual_block_forward.1
= control target key start
LH: loop header
LB: loop body
LE: loop exit
PB: predicated region body
PF: predicated region fallthrough
CT: control target
= control target key end

     0   :  { %8 = vsyncpa [#allocation3], 0  ;;  %s344_s0 = inlined_call_operand.hbm [shape: f32[16,32], index: 0, kind: input, shape index: {}]   ;;  %s345_s1 = inlined_call_operand.hbm [shape: f32[32,32], index: 1, kind: input, shape index: {}]   ;;  %s346_s2 = inlined_call_operand.vmem [shape: f32[1,32], index: 2, kind: input, shape index: {}]   ;;  %s347_s3 = inlined_call_operand.hbm [shape: f32[16,32], index: 3, kind: output, shape index: {}]  }
   0x1   :  { %9 = vsyncpa [#allocation6], 0 }
   0x2   :  { %10 = vsyncpa [#allocation4], 0  ;;  %s267_s12 = smov [#allocation2]   ;;  %s195_s16 = scalar_lea.hbm %s344_s0, 256 }
   0x3   :  { %s16_s13 = sshll.u32 %s267_s12, 4  ;;  %p196_p0 = scmp.ne.s32.totalorder %s344_s0, %s195_s16  ;;  %s17_s13 = int_to_ptr.vmem [resolvable:$true] %s16_s13 }
   0x4   :  { %p199_p1 = scmp.lt.u32.totalorder %s195_s16, %s344_s0 }
   0x6   :  { %p201_p2 = pnand %p199_p1, %p196_p0 }
   0x8   :  { %204 = shalt.err (!%p201_p2)
}
   0x9   :  { %s205_s21 = scalar_lea.vmem %s17_s13, 256  ;;  %p210_p4 = scmp.lt.s32.totalorder %s17_s13, %s17_s13 }
   0xa   :  { %p206_p3 = scmp.ne.s32.totalorder %s17_s13, %s205_s21  ;;  %p211_p5 = scmp.lt.s32.totalorder %s205_s21, %s205_s21 }
   0xc   :  { %p212_p6 = por %p211_p5, %p210_p4 }
   0xe   :  { %p213_p7 = pnand %p212_p6, %p206_p3 }
  0x10   :  { %216 = shalt.err (!%p213_p7)
}
  0x11   :  { %s268_s22 = smov 128   ;;  %s269_s23 = smov 8  }
  0x12   :  { %22 = dma.hbm_to_vmem [thread:$0]  %s344_s0, 256, %s17_s13, [#allocation3], %s268_s22, %s268_s22, %s269_s23  }
  0x13   :  { %s270_s26 = smov [#allocation5]   ;;  %s217_s30 = scalar_lea.hbm %s345_s1, 512 }
  0x14   :  { %s28_s27 = sshll.u32 %s270_s26, 4  ;;  %p218_p8 = scmp.ne.s32.totalorder %s345_s1, %s217_s30  ;;  %s29_s27 = int_to_ptr.vmem [resolvable:$true] %s28_s27 }
  0x15   :  { %p221_p9 = scmp.lt.u32.totalorder %s217_s30, %s345_s1 }
  0x17   :  { %p223_p10 = pnand %p221_p9, %p218_p8 }
  0x19   :  { %226 = shalt.err (!%p223_p10)
}
  0x1a   :  { %s227_s8 = scalar_lea.vmem %s29_s27, 512  ;;  %p232_p12 = scmp.lt.s32.totalorder %s29_s27, %s29_s27 }
  0x1b   :  { %p228_p11 = scmp.ne.s32.totalorder %s29_s27, %s227_s8  ;;  %p233_p13 = scmp.lt.s32.totalorder %s227_s8, %s227_s8 }
  0x1d   :  { %p234_p0 = por %p233_p13, %p232_p12 }
  0x1f   :  { %p235_p1 = pnand %p234_p0, %p228_p11 }
  0x21   :  { %238 = shalt.err (!%p235_p1)
}
  0x22   :  { %34 = dma.hbm_to_vmem [thread:$0]  %s345_s1, 512, %s29_s27, [#allocation6], %s268_s22, %s268_s22, %s269_s23  }
  0x23   :  { %261 = dma.done.wait [#allocation3], 256  }
  0x24   :  { %262 = vsyncadd [#allocation3], 4294967040 }
  0x25   :  { %263 = dma.done.wait [#allocation6], 512  }
  0x26   :  { %264 = vsyncadd [#allocation6], 4294966784  ;;  %vm56_vm0 = vcmask 261120   ;;  %v45_v0 = vld [vmem:[#allocation5] sm:$0xff]  ;;  %v46_v1 = vld [vmem:[#allocation5 + $0x8] sm:$0xff]  ;;  %s271_s11 = smov [#allocation7]  }
  0x27   :  { %v47_v2 = vld [vmem:[#allocation5 + $0x10] sm:$0xff]  ;;  %v182_v3 = vpack.c.bf16 %v46_v1, %v45_v0  ;;  %v48_v4 = vld [vmem:[#allocation5 + $0x18] sm:$0xff]  ;;  %s149_s12 = sshll.u32 %s271_s11, 4  ;;  %s150_s12 = int_to_ptr.vmem [resolvable:$true] %s149_s12 }
  0x28   :  { %v43_v5 = vld [vmem:[#allocation2] sm:$0xff]  ;;  %v186_v6 = vpack.c.bf16 %v48_v4, %v47_v2  ;;  %v44_v7 = vld [vmem:[#allocation2 + $0x8] sm:$0xff]  ;;  %s239_s13 = scalar_lea.vmem %s150_s12, 256  ;;  %p244_p3 = scmp.lt.s32.totalorder %s150_s12, %s150_s12 }
  0x29   :  { %179 = vmatprep.mubr.msk.f32.mxu0 %vm56_vm0, %v43_v5  ;;  %183 = vmatprep.subr.bf16.mxu0 %v182_v3  ;;  %v162_v8 = vld [vmem:[%s346_s2] ss:$0 sm:$0xff]  ;;  %p240_p2 = scmp.ne.s32.totalorder %s150_s12, %s239_s13  ;;  %p245_p4 = scmp.lt.s32.totalorder %s239_s13, %s239_s13 }
  0x2a   :  { %185 = vmatpush3.bf16.msra.mxu0 %v182_v3 }
  0x2b   :  { %187 = vmatprep.subr.bf16.mxu0 %v186_v6  ;;  %p246_p5 = por %p245_p4, %p244_p3 }
  0x2d   :  { %p247_p6 = pnand %p246_p5, %p240_p2 }
  0x2e   :  { %189 = vmatpush3.bf16.msra.mxu0 %v186_v6 }
  0x31   :  { %180 = vmatmul.mubr.msk.f32.vlgmr.msra.gmra.mrb[0].mxu0 %vm56_vm0, %v44_v7 }
 0x104   :  { %v181_v9 = vpop.f32.mrb[0].mxu0 }
 0x105   :  { %v135_v10 = vadd.f32 %v181_v9, %v162_v8  ;;  %v129_v11 = vpop.f32.mrb[1].mxu0 }
 0x106   :  { %v130_v12 = vadd.f32 %v162_v8, %v129_v11 }
 0x107   :  { %v139_v13 = vmax.f32 %v135_v10, 0.0 }
 0x108   :  { %v138_v14 = vmax.f32 %v130_v12, 0.0 }
 0x109   :  { %v141_v15 = vadd.f32 %v139_v13, %v44_v7 }
 0x10a   :  { %v140_v16 = vadd.f32 %v138_v14, %v43_v5 }
 0x10b   :  { %143 = vst.msk [vmem:[#allocation7 + $0x8] sm:$0xff] %vm56_vm0, %v141_v15 }
 0x10c   :  { %142 = vst.msk [vmem:[#allocation7] sm:$0xff] %vm56_vm0, %v140_v16 }
 0x10d   :  { %250 = shalt.err (!%p247_p6)
}
 0x10e   :  { %s251_s15 = scalar_lea.hbm %s347_s3, 256 }
 0x10f   :  { %p252_p7 = scmp.ne.s32.totalorder %s347_s3, %s251_s15  ;;  %p255_p8 = scmp.lt.u32.totalorder %s251_s15, %s347_s3 }
 0x111   :  { %p257_p9 = pnand %p255_p8, %p252_p7 }
 0x113   :  { %260 = shalt.err (!%p257_p9)
}
 0x114   :  { %155 = dma.vmem_to_hbm [thread:$0]  %s150_s12, 256, %s347_s3, [#allocation4], %s268_s22, %s268_s22, %s269_s23  }
 0x115   :  { %265 = dma.done.wait [#allocation4], 256  }
 0x116   :  { %266 = vsyncadd [#allocation4], 4294967040 }
 0x117   :  { %159 = vsyncpa [#allocation3], 1 }
 0x118   :  { %160 = vsyncpa [#allocation6], 1 }
 0x119   :  { %161 = vsyncpa [#allocation4], 1 }

</bundles_post_ra>
